<compile_context>
chip_gen: v7x
topology: tpu7x:2x2x1
jax: 0.10.0
libtpu: 0.0.40
codegen_flags: <defaults>
</compile_context>

<pallas_src>
import functools

import jax
import jax.numpy as jnp
from jax.experimental import pallas as pl
from jax.experimental.pallas import tpu as pltpu

_LANE = 128
_SUBLANE = 8


def _round_up(x, m):
    return ((x + m - 1) // m) * m


def _pick_tm(batch):
    """Batch-tile heuristic.

    - tiny batches: a single block equal to the full batch extent (allowed by
      the (8,128) rule when the block equals the full array dim).
    - v5e: cap at 128 rows (4x128^2 MXU, single vector-store slot).
    - v6e/v7x: up to 1024 rows (per-step VMEM stays well under 1 MiB), but keep
      at least 2 grid steps for big batches so the "parallel" batch axis can be
      split across the two TensorCores on v7x.
    """
    if batch <= _SUBLANE:
        return batch
    try:
        kind = jax.devices()[0].device_kind.lower()
    except Exception:  # pragma: no cover - defensive; fall back to big tiles
        kind = ""
    is_v5e = ("v5 lite" in kind) or ("v5e" in kind) or ("v5litepod" in kind)
    cap = 128 if is_v5e else 1024
    tm = min(cap, _round_up(batch, _SUBLANE))
    if batch >= 256 and pl.cdiv(batch, tm) < 2:
        tm = _round_up(pl.cdiv(batch, 2), _SUBLANE)
    return tm


def classifier_kernel(ids_ref, w1_ref, b1_ref, w2_ref, b2_ref, o_ref, *, L, V):
    """ids [tm,L] i32; w1 [L*V,Hp] bf16 (emb folded in); b1 [1,Hp] f32;
    w2 [Hp,C] bf16; b2 [1,C] f32; out [tm,C] f32."""
    ids = ids_ref[...]                                     # (tm, L) int32
    tm = ids.shape[0]
    v_iota = jax.lax.broadcasted_iota(jnp.int32, (tm, V), 1)
    # Embedding lookup as a one-hot selection fused into fc1:
    #   w1_ref[l*V + v, :] == emb[v, :] @ w1[l*D:(l+1)*D, :]   (pre-folded)
    pieces = [(ids[:, l:l + 1] == v_iota).astype(jnp.float32) for l in range(L)]
    onehot = jnp.concatenate(pieces, axis=1).astype(jnp.bfloat16)   # (tm, L*V)

    # fc1 (+ embedding): bf16 MXU matmul, f32 accumulation; bias + ReLU on VPU.
    h = jnp.dot(onehot, w1_ref[...], preferred_element_type=jnp.float32)
    h = jnp.maximum(h + b1_ref[...], 0.0)
    # dropout: identity at inference time.
    # TODO(synk): train-mode dropout masking (pltpu.prng_*) not implemented.

    # fc2 in bf16 on the MXU (h is already in vregs; one cheap cast).
    logits = jnp.dot(h.astype(jnp.bfloat16), w2_ref[...],
                     preferred_element_type=jnp.float32) + b2_ref[...]

    # softmax over the (tiny, unpadded) class axis; exact division so each row
    # sums to 1 to f32 accuracy.
    m = jnp.max(logits, axis=1, keepdims=True)
    e = jnp.exp(logits - m)
    o_ref[...] = (e / jnp.sum(e, axis=1, keepdims=True)).astype(o_ref.dtype)


def prepare_params(emb_table, w1, b1, w2, b2, sentence_length):
    """One-time weight prep (init-time, not per call): fold the embedding table
    into fc1, cast weights to bf16 and pad the hidden dim to a lane multiple."""
    V, D = emb_table.shape
    K, H = w1.shape
    L = int(sentence_length)
    assert K == L * D, "fc1 in_features must equal sentence_length * embedded_dim"
    C = w2.shape[1]
    Hp = _round_up(H, _LANE)

    # w1 rows are ordered (l, d) -> l*D + d  (torch.flatten(start_dim=1)).
    w1_ld = jnp.asarray(w1, jnp.float32).reshape(L, D, H)
    # w1_fused[l*V + v, :] = emb[v, :] @ w1[l*D:(l+1)*D, :]
    w1_fused = jnp.einsum("vd,ldh->lvh",
                          jnp.asarray(emb_table, jnp.float32),
                          w1_ld).reshape(L * V, H)

    w1_p = jnp.zeros((L * V, Hp), jnp.bfloat16).at[:, :H].set(
        w1_fused.astype(jnp.bfloat16))
    b1_p = jnp.zeros((1, Hp), jnp.float32).at[0, :H].set(
        jnp.asarray(b1, jnp.float32))
    w2_p = jnp.zeros((Hp, C), jnp.bfloat16).at[:H, :].set(
        jnp.asarray(w2, jnp.bfloat16))
    b2_p = jnp.asarray(b2, jnp.float32).reshape(1, C)
    return w1_p, b1_p, w2_p, b2_p


@jax.jit
def classifier_forward(token_ids, w1_p, b1_p, w2_p, b2_p):
    """token_ids [B,L] int32; prepared params from prepare_params()
    -> probs [B,C] float32 (same semantics as the PyTorch module in eval mode)."""
    B, L = token_ids.shape
    LV, Hp = w1_p.shape
    V = LV // L
    C = w2_p.shape[1]

    tm = _pick_tm(B)
    grid = (pl.cdiv(B, tm),)

    flops = 2 * B * LV * Hp + 2 * B * Hp * C
    bytes_accessed = (B * L * 4            # token ids in
                      + LV * Hp * 2        # fused fc1 weights (resident)
                      + Hp * 4 + Hp * C * 2 + C * 4
                      + B * C * 4)         # compact probability write

    kernel = functools.partial(classifier_kernel, L=L, V=V)
    return pl.pallas_call(
        kernel,
        out_shape=jax.ShapeDtypeStruct((B, C), jnp.float32),
        grid=grid,
        in_specs=[
            pl.BlockSpec((tm, L), lambda i: (i, 0)),    # token ids, tiled over batch
            pl.BlockSpec((LV, Hp), lambda i: (0, 0)),   # fused emb+fc1 weights (resident)
            pl.BlockSpec((1, Hp), lambda i: (0, 0)),    # fc1 bias
            pl.BlockSpec((Hp, C), lambda i: (0, 0)),    # fc2 weights (resident)
            pl.BlockSpec((1, C), lambda i: (0, 0)),     # fc2 bias
        ],
        out_specs=pl.BlockSpec((tm, C), lambda i: (i, 0)),
        compiler_params=pltpu.CompilerParams(
            dimension_semantics=("parallel",)),         # both TCs on v7x
        cost_estimate=pl.CostEstimate(
            flops=flops, transcendentals=B * C, bytes_accessed=bytes_accessed),
    )(token_ids, w1_p, b1_p, w2_p, b2_p)


if __name__ == "__main__":
    # Small deterministic config consistent with the module's __init__:
    #   vocab_size=32, embedded_dim=16, sentence_length=8,
    #   hidden_size = 3 * embedded_dim = 48, num_classes=4, batch=2.
    vocab_size = 32
    embedded_dim = 16
    sentence_length = 8
    hidden_size = 3 * embedded_dim
    num_classes = 4
    batch = 2

    key = jax.random.PRNGKey(0)
    k_emb, k_w1, k_b1, k_w2, k_b2, k_ids = jax.random.split(key, 6)

    emb_table = jax.random.normal(k_emb, (vocab_size, embedded_dim), jnp.float32) * 0.1
    w1 = jax.random.normal(
        k_w1, (embedded_dim * sentence_length, hidden_size), jnp.float32) * 0.05
    b1 = jax.random.normal(k_b1, (hidden_size,), jnp.float32) * 0.01
    w2 = jax.random.normal(k_w2, (hidden_size, num_classes), jnp.float32) * 0.05
    b2 = jax.random.normal(k_b2, (num_classes,), jnp.float32) * 0.01

    token_ids = jax.random.randint(
        k_ids, (batch, sentence_length), 0, vocab_size, dtype=jnp.int32)

    # One-time parameter prep (embedding folded into fc1, bf16 + lane padding).
    w1_p, b1_p, w2_p, b2_p = prepare_params(emb_table, w1, b1, w2, b2, sentence_length)

    probs = classifier_forward(token_ids, w1_p, b1_p, w2_p, b2_p)
    probs = jax.block_until_ready(probs)

    # Pure-f32 reference with the original (unfused) dataflow:
    # embedding -> flatten -> fc1 -> relu -> fc2 -> softmax.
    x_ref = jnp.take(emb_table, token_ids, axis=0).reshape(batch, -1)
    h_ref = jnp.maximum(x_ref @ w1 + b1, 0.0)
    logits_ref = h_ref @ w2 + b2
    probs_ref = jax.nn.softmax(logits_ref, axis=1)

    assert probs.shape == (batch, num_classes)
    assert bool(jnp.all(jnp.isfinite(probs)))
    # Exact in-kernel division -> rows sum to 1 to f32 accuracy.
    assert jnp.allclose(probs.sum(axis=1), 1.0, atol=1e-4)
    # bf16 weights in the kernel vs. f32 reference -> a few e-4 absolute at most.
    assert jnp.allclose(probs, probs_ref, atol=3e-3, rtol=3e-3)

    print("KERNEL_OK")
</pallas_src>

<mosaic_0001>
module attributes {stable_mosaic.version = 11 : i64} {
  func.func @classifier_kernel(%arg0: i32, %arg1: memref<2x8xi32, #tpu.memory_space<vmem>>, %arg2: memref<256x128xbf16, #tpu.memory_space<vmem>>, %arg3: memref<1x128xf32, #tpu.memory_space<vmem>>, %arg4: memref<128x4xbf16, #tpu.memory_space<vmem>>, %arg5: memref<1x4xf32, #tpu.memory_space<vmem>>, %arg6: memref<2x4xf32, #tpu.memory_space<vmem>>) attributes {dimension_semantics = [#tpu.dimension_semantics<parallel>], iteration_bounds = array<i64: 1>, scalar_prefetch = 0 : i64, scratch_operands = 0 : i64, tpu.core_type = #tpu.core_type<tc>, window_params = [{transform_indices = @transform_0, window_bounds = array<i64: 2, 8>}, {pipeline_mode = #tpu.pipeline_mode<synchronous>, transform_indices = @transform_1, window_bounds = array<i64: 256, 128>}, {pipeline_mode = #tpu.pipeline_mode<synchronous>, transform_indices = @transform_2, window_bounds = array<i64: 1, 128>}, {pipeline_mode = #tpu.pipeline_mode<synchronous>, transform_indices = @transform_3, window_bounds = array<i64: 128, 4>}, {pipeline_mode = #tpu.pipeline_mode<synchronous>, transform_indices = @transform_4, window_bounds = array<i64: 1, 4>}, {transform_indices = @transform_5, window_bounds = array<i64: 2, 4>}]} {
    %c0 = arith.constant 0 : index
    %c0_0 = arith.constant 0 : index
    %0 = vector.load %arg1[%c0, %c0_0] : memref<2x8xi32, #tpu.memory_space<vmem>>, vector<2x8xi32>
    %1 = tpu.iota {dimensions = array<i32: 1>} : vector<2x32xi32>
    %2 = vector.extract_strided_slice %0 {offsets = [0, 0], sizes = [2, 1], strides = [1, 1]} : vector<2x8xi32> to vector<2x1xi32>
    %3 = vector.broadcast %2 : vector<2x1xi32> to vector<2x32xi32>
    %4 = arith.cmpi eq, %3, %1 : vector<2x32xi32>
    %5 = arith.extui %4 : vector<2x32xi1> to vector<2x32xi32>
    %6 = arith.sitofp %5 : vector<2x32xi32> to vector<2x32xf32>
    %7 = vector.extract_strided_slice %0 {offsets = [0, 1], sizes = [2, 1], strides = [1, 1]} : vector<2x8xi32> to vector<2x1xi32>
    %8 = vector.broadcast %7 : vector<2x1xi32> to vector<2x32xi32>
    %9 = arith.cmpi eq, %8, %1 : vector<2x32xi32>
    %10 = arith.extui %9 : vector<2x32xi1> to vector<2x32xi32>
    %11 = arith.sitofp %10 : vector<2x32xi32> to vector<2x32xf32>
    %12 = vector.extract_strided_slice %0 {offsets = [0, 2], sizes = [2, 1], strides = [1, 1]} : vector<2x8xi32> to vector<2x1xi32>
    %13 = vector.broadcast %12 : vector<2x1xi32> to vector<2x32xi32>
    %14 = arith.cmpi eq, %13, %1 : vector<2x32xi32>
    %15 = arith.extui %14 : vector<2x32xi1> to vector<2x32xi32>
    %16 = arith.sitofp %15 : vector<2x32xi32> to vector<2x32xf32>
    %17 = vector.extract_strided_slice %0 {offsets = [0, 3], sizes = [2, 1], strides = [1, 1]} : vector<2x8xi32> to vector<2x1xi32>
    %18 = vector.broadcast %17 : vector<2x1xi32> to vector<2x32xi32>
    %19 = arith.cmpi eq, %18, %1 : vector<2x32xi32>
    %20 = arith.extui %19 : vector<2x32xi1> to vector<2x32xi32>
    %21 = arith.sitofp %20 : vector<2x32xi32> to vector<2x32xf32>
    %22 = vector.extract_strided_slice %0 {offsets = [0, 4], sizes = [2, 1], strides = [1, 1]} : vector<2x8xi32> to vector<2x1xi32>
    %23 = vector.broadcast %22 : vector<2x1xi32> to vector<2x32xi32>
    %24 = arith.cmpi eq, %23, %1 : vector<2x32xi32>
    %25 = arith.extui %24 : vector<2x32xi1> to vector<2x32xi32>
    %26 = arith.sitofp %25 : vector<2x32xi32> to vector<2x32xf32>
    %27 = vector.extract_strided_slice %0 {offsets = [0, 5], sizes = [2, 1], strides = [1, 1]} : vector<2x8xi32> to vector<2x1xi32>
    %28 = vector.broadcast %27 : vector<2x1xi32> to vector<2x32xi32>
    %29 = arith.cmpi eq, %28, %1 : vector<2x32xi32>
    %30 = arith.extui %29 : vector<2x32xi1> to vector<2x32xi32>
    %31 = arith.sitofp %30 : vector<2x32xi32> to vector<2x32xf32>
    %32 = vector.extract_strided_slice %0 {offsets = [0, 6], sizes = [2, 1], strides = [1, 1]} : vector<2x8xi32> to vector<2x1xi32>
    %33 = vector.broadcast %32 : vector<2x1xi32> to vector<2x32xi32>
    %34 = arith.cmpi eq, %33, %1 : vector<2x32xi32>
    %35 = arith.extui %34 : vector<2x32xi1> to vector<2x32xi32>
    %36 = arith.sitofp %35 : vector<2x32xi32> to vector<2x32xf32>
    %37 = vector.extract_strided_slice %0 {offsets = [0, 7], sizes = [2, 1], strides = [1, 1]} : vector<2x8xi32> to vector<2x1xi32>
    %38 = vector.broadcast %37 : vector<2x1xi32> to vector<2x32xi32>
    %39 = arith.cmpi eq, %38, %1 : vector<2x32xi32>
    %40 = arith.extui %39 : vector<2x32xi1> to vector<2x32xi32>
    %41 = arith.sitofp %40 : vector<2x32xi32> to vector<2x32xf32>
    %42 = tpu.concatenate %6, %11, %16, %21, %26, %31, %36, %41 in 1 : vector<2x32xf32>, vector<2x32xf32>, vector<2x32xf32>, vector<2x32xf32>, vector<2x32xf32>, vector<2x32xf32>, vector<2x32xf32>, vector<2x32xf32> -> vector<2x256xf32>
    %43 = arith.truncf %42 : vector<2x256xf32> to vector<2x256xbf16>
    %c0_1 = arith.constant 0 : index
    %c0_2 = arith.constant 0 : index
    %44 = vector.load %arg2[%c0_1, %c0_2] : memref<256x128xbf16, #tpu.memory_space<vmem>>, vector<256x128xbf16>
    %cst = arith.constant dense<0.000000e+00> : vector<2x128xf32>
    %45 = tpu.matmul %43, %44, %cst {dimension_numbers = #tpu.dot_dimension_numbers<[1], [0], [0], [1], [0, 0, 1, 1], [], []>} : vector<2x256xbf16>, vector<256x128xbf16>, vector<2x128xf32> -> vector<2x128xf32>
    %c0_3 = arith.constant 0 : index
    %c0_4 = arith.constant 0 : index
    %46 = vector.load %arg3[%c0_3, %c0_4] : memref<1x128xf32, #tpu.memory_space<vmem>>, vector<1x128xf32>
    %47 = vector.broadcast %46 : vector<1x128xf32> to vector<2x128xf32>
    %48 = arith.addf %45, %47 : vector<2x128xf32>
    %cst_5 = arith.constant 0.000000e+00 : f32
    %49 = vector.broadcast %cst_5 : f32 to vector<2x128xf32>
    %50 = arith.maximumf %48, %49 : vector<2x128xf32>
    %51 = arith.truncf %50 : vector<2x128xf32> to vector<2x128xbf16>
    %c0_6 = arith.constant 0 : index
    %c0_7 = arith.constant 0 : index
    %52 = vector.load %arg4[%c0_6, %c0_7] : memref<128x4xbf16, #tpu.memory_space<vmem>>, vector<128x4xbf16>
    %cst_8 = arith.constant dense<0.000000e+00> : vector<2x4xf32>
    %53 = tpu.matmul %51, %52, %cst_8 {dimension_numbers = #tpu.dot_dimension_numbers<[1], [0], [0], [1], [0, 0, 1, 1], [], []>} : vector<2x128xbf16>, vector<128x4xbf16>, vector<2x4xf32> -> vector<2x4xf32>
    %c0_9 = arith.constant 0 : index
    %c0_10 = arith.constant 0 : index
    %54 = vector.load %arg5[%c0_9, %c0_10] : memref<1x4xf32, #tpu.memory_space<vmem>>, vector<1x4xf32>
    %55 = vector.broadcast %54 : vector<1x4xf32> to vector<2x4xf32>
    %56 = arith.addf %53, %55 : vector<2x4xf32>
    %cst_11 = arith.constant dense<0xFF800000> : vector<2xf32>
    %57 = vector.multi_reduction <maximumf>, %56, %cst_11 [1] : vector<2x4xf32> to vector<2xf32>
    %58 = vector.shape_cast %57 : vector<2xf32> to vector<2x1xf32>
    %59 = vector.broadcast %58 : vector<2x1xf32> to vector<2x4xf32>
    %60 = arith.subf %56, %59 : vector<2x4xf32>
    %61 = math.exp %60 : vector<2x4xf32>
    %cst_12 = arith.constant dense<0.000000e+00> : vector<2xf32>
    %62 = vector.multi_reduction <add>, %61, %cst_12 [1] : vector<2x4xf32> to vector<2xf32>
    %63 = vector.shape_cast %62 : vector<2xf32> to vector<2x1xf32>
    %64 = vector.broadcast %63 : vector<2x1xf32> to vector<2x4xf32>
    %65 = arith.divf %61, %64 : vector<2x4xf32>
    %c0_13 = arith.constant 0 : index
    %c0_14 = arith.constant 0 : index
    %66 = vector.load %arg6[%c0_13, %c0_14] : memref<2x4xf32, #tpu.memory_space<vmem>>, vector<2x4xf32>
    tpu.vector_store %arg6[%c0_13, %c0_14], %65 {strides = array<i32>} : memref<2x4xf32, #tpu.memory_space<vmem>>, vector<2x4xf32>,
    return
  }
  func.func @transform_0(%arg0: i32) -> (i32, i32) {
    %c0_i32 = arith.constant 0 : i32
    %c0_i32_0 = arith.constant 0 : i32
    return %arg0, %c0_i32 : i32, i32
  }
  func.func @transform_1(%arg0: i32) -> (i32, i32) {
    %c0_i32 = arith.constant 0 : i32
    %c0_i32_0 = arith.constant 0 : i32
    %c0_i32_1 = arith.constant 0 : i32
    return %c0_i32, %c0_i32_0 : i32, i32
  }
  func.func @transform_2(%arg0: i32) -> (i32, i32) {
    %c0_i32 = arith.constant 0 : i32
    %c0_i32_0 = arith.constant 0 : i32
    %c0_i32_1 = arith.constant 0 : i32
    return %c0_i32, %c0_i32_0 : i32, i32
  }
  func.func @transform_3(%arg0: i32) -> (i32, i32) {
    %c0_i32 = arith.constant 0 : i32
    %c0_i32_0 = arith.constant 0 : i32
    %c0_i32_1 = arith.constant 0 : i32
    return %c0_i32, %c0_i32_0 : i32, i32
  }
  func.func @transform_4(%arg0: i32) -> (i32, i32) {
    %c0_i32 = arith.constant 0 : i32
    %c0_i32_0 = arith.constant 0 : i32
    %c0_i32_1 = arith.constant 0 : i32
    return %c0_i32, %c0_i32_0 : i32, i32
  }
  func.func @transform_5(%arg0: i32) -> (i32, i32) {
    %c0_i32 = arith.constant 0 : i32
    %c0_i32_0 = arith.constant 0 : i32
    return %arg0, %c0_i32 : i32, i32
  }
}

</mosaic_0001>

<bundles_post_ra>
// kernel: classifier_forward.1
= control target key start
LH: loop header
LB: loop body
LE: loop exit
PB: predicated region body
PF: predicated region fallthrough
CT: control target
= control target key end

     0   :  { %10 = vsyncpa [#allocation3], 0  ;;  %s765_s0 = inlined_call_operand.vmem [shape: s32[2,8], index: 0, kind: input, shape index: {}]   ;;  %s766_s1 = inlined_call_operand.hbm [shape: bf16[256,128], index: 1, kind: input, shape index: {}]   ;;  %s767_s2 = inlined_call_operand.vmem [shape: f32[1,128], index: 2, kind: input, shape index: {}]   ;;  %s768_s3 = inlined_call_operand.vmem [shape: bf16[128,4], index: 3, kind: input, shape index: {}]   ;;  %s769_s4 = inlined_call_operand.vmem [shape: f32[1,4], index: 4, kind: input, shape index: {}]   ;;  %s770_s5 = inlined_call_operand.hbm [shape: f32[2,4], index: 5, kind: output, shape index: {}]  }
   0x1   :  { %11 = vsyncpa [#allocation4], 0  ;;  %s639_s18 = smov [#allocation2]   ;;  %s591_s22 = scalar_lea.hbm %s766_s1, 2048 }
   0x2   :  { %s19_s19 = sshll.u32 %s639_s18, 4  ;;  %p592_p0 = scmp.ne.s32.totalorder %s766_s1, %s591_s22  ;;  %s20_s19 = int_to_ptr.vmem [resolvable:$true] %s19_s19 }
   0x3   :  { %p595_p1 = scmp.lt.u32.totalorder %s591_s22, %s766_s1 }
   0x5   :  { %p597_p2 = pnand %p595_p1, %p592_p0 }
   0x7   :  { %600 = shalt.err (!%p597_p2)
}
   0x8   :  { %s601_s27 = scalar_lea.vmem %s20_s19, 2048  ;;  %p606_p4 = scmp.lt.s32.totalorder %s20_s19, %s20_s19 }
   0x9   :  { %p602_p3 = scmp.ne.s32.totalorder %s20_s19, %s601_s27  ;;  %p607_p5 = scmp.lt.s32.totalorder %s601_s27, %s601_s27 }
   0xb   :  { %p608_p6 = por %p607_p5, %p606_p4 }
   0xd   :  { %p609_p7 = pnand %p608_p6, %p602_p3 }
   0xf   :  { %612 = shalt.err (!%p609_p7)
}
  0x10   :  { %s640_s28 = smov 64   ;;  %s641_s29 = smov 4  }
  0x11   :  { %25 = dma.hbm_to_vmem [thread:$0]  %s766_s1, 2048, %s20_s19, [#allocation3], %s640_s28, %s640_s28, %s641_s29  }
  0x12   :  { %635 = dma.done.wait [#allocation3], 2048  }
  0x13   :  { %636 = vsyncadd [#allocation3], 4294965248  ;;  %v642_v0 = vmov 6   ;;  %v643_v1 = vmov 5   ;;  %v644_v2 = vmov 0.0   ;;  %v645_v4 = vmov 2  }
  0x14   :  { %541 = vset.pattern.permute.xlu1 %v642_v0  ;;  %539 = vset.pattern.permute.xlu0 %v643_v1  ;;  %v36_v3 = vld [vmem:[%s765_s0] sm:$0x3]  ;;  %v646_v5 = vmov 1   ;;  %v647_v6 = vmov 7   ;;  %v648_v7 = vmov 3   ;;  %v649_v8 = vmov 4  }
  0x15   :  { %503 = vmatprep.subr.bf16.mxu1 %v644_v2  ;;  %76 = vperm.xlu1 %541, %v36_v3   ;;  %v563_v9 = vld [vmem:[#allocation2 + $0x40] sm:$0xff]   ;;  %v565_v11 = vld [vmem:[#allocation2 + $0x48] sm:$0xff]   ;;  %v567_v13 = vld [vmem:[#allocation2 + $0x50] sm:$0xff]   ;;  %v650_v14 = vmov 0   ;;  %v37_v22 = vlaneseq  ;;  %s651_s9 = smov 32   ;;  %s652_s12 = smov 96  }
  0x16   :  { %70 = vperm.xlu0 %539, %v36_v3   ;;  %v564_v10 = vld [vmem:[#allocation2] sm:$0xff]   ;;  %472 = vmatprep.subr.bf16.mxu0 %v563_v9  ;;  %v566_v12 = vld [vmem:[#allocation2 + $0x8] sm:$0xff]   ;;  %v568_v15 = vld [vmem:[#allocation2 + $0x10] sm:$0xff]   ;;  %vm111_vm8 = vcmask 261120   ;;  %vm113_vm9 = vcmask 523264   ;;  %vm115_vm10 = vcmask 785408  }
  0x17   :  { %473 = vmatpush3.bf16.msra.mxu0 %v564_v10  ;;  %v569_v16 = vld [vmem:[#allocation2 + $0x58] sm:$0xff]   ;;  %v571_v18 = vld [vmem:[#allocation2 + $0x60] sm:$0xff]   ;;  %v573_v20 = vld [vmem:[#allocation2 + $0x68] sm:$0xff]   ;;  %v38_v25 = vand.u32 127, %v37_v22  ;;  %vm653_vm11 = vmmov 0   ;;  %vm410_vm12 = vcmask 25600  }
  0x18   :  { %474 = vmatprep.subr.bf16.mxu0 %v565_v11  ;;  %v570_v17 = vld [vmem:[#allocation2 + $0x18] sm:$0xff]   ;;  %v572_v19 = vld [vmem:[#allocation2 + $0x20] sm:$0xff]   ;;  %v574_v21 = vld [vmem:[#allocation2 + $0x28] sm:$0xff]   ;;  %519 = vmatprep.mubr.msk.bf16.mxu1 %vm653_vm11, %v644_v2 }
  0x19   :  { %542 = vset.pattern.permute.xlu1 %v645_v4  ;;  %v575_v23 = vld [vmem:[#allocation2 + $0x70] sm:$0xff]   ;;  %v577_v28 = vld [vmem:[#allocation2 + $0x78] sm:$0xff]   ;;  %v579_v38 = vld [vmem:[%s768_s3] sm:$0xff]  }
  0x1a   :  { %540 = vset.pattern.permute.xlu0 %v646_v5  ;;  %52 = vperm.xlu1 %542, %v36_v3   ;;  %v576_v24 = vld [vmem:[#allocation2 + $0x30] sm:$0xff]   ;;  %v578_v29 = vld [vmem:[#allocation2 + $0x38] sm:$0xff]   ;;  %v580_v41 = vld [vmem:[%s768_s3 + $0x8] sm:$0xff]  }
  0x1b   :  { %46 = vperm.xlu0 %540, %v36_v3   ;;  %475 = vmatpush3.bf16.msra.mxu0 %v566_v12  ;;  %v581_v45 = vld [vmem:[%s768_s3 + $0x10] sm:$0xff]   ;;  %v582_v46 = vld [vmem:[%s768_s3 + $0x18] sm:$0xff]   ;;  %v583_v47 = vld [vmem:[%s768_s3 + $0x20] sm:$0xff]  }
  0x1c   :  { %476 = vmatprep.subr.bf16.mxu0 %v567_v13  ;;  %504 = vmatpush3.bf16.msra.mxu1 %v579_v38  ;;  %v584_v48 = vld [vmem:[%s768_s3 + $0x28] sm:$0xff]   ;;  %v446_v10 = vld [vmem:[%s767_s2] ss:$0 sm:$0xff]  ;;  %s654_s2 = smov [#allocation5]  }
  0x1d   :  { %505 = vmatprep.subr.bf16.mxu1 %v644_v2 }
  0x1e   :  { %543 = vset.pattern.permute.xlu1 %v647_v6 }
  0x1f   :  { %544 = vset.pattern.permute.xlu0 %v648_v7  ;;  %82 = vperm.xlu1 %543, %v36_v3   ;;  %v585_v7 = vld [vmem:[%s768_s3 + $0x30] sm:$0xff]  }
  0x20   :  { %58 = vperm.xlu0 %544, %v36_v3   ;;  %477 = vmatpush3.bf16.msra.mxu0 %v568_v15 }
  0x21   :  { %478 = vmatprep.subr.bf16.mxu0 %v569_v16  ;;  %506 = vmatpush3.bf16.msra.mxu1 %v580_v41 }
  0x22   :  { %507 = vmatprep.subr.bf16.mxu1 %v644_v2 }
  0x23   :  { %545 = vset.pattern.permute.xlu1 %v649_v8  ;;  %v586_v8 = vld [vmem:[%s768_s3 + $0x38] sm:$0xff]   ;;  %s429_s3 = sshll.u32 %s654_s2, 4  ;;  %s430_s3 = int_to_ptr.vmem [resolvable:$true] %s429_s3 }
  0x24   :  { %562 = vset.pattern.permute.xlu0 %v647_v6  ;;  %64 = vperm.xlu1 %545, %v36_v3   ;;  %p618_p9 = scmp.lt.s32.totalorder %s430_s3, %s430_s3 }
  0x25   :  { %479 = vmatpush3.bf16.msra.mxu0 %v570_v17  ;;  %508 = vmatpush3.bf16.msra.mxu1 %v581_v45 }
  0x26   :  { %480 = vmatprep.subr.bf16.mxu0 %v571_v18  ;;  %509 = vmatprep.subr.bf16.mxu1 %v644_v2  ;;  %v463_v18 = vld [vmem:[%s769_s4] ss:$0 sm:$0xff]  ;;  %s613_s4 = scalar_lea.vmem %s430_s3, 32 }
  0x27   :  { %p614_p8 = scmp.ne.s32.totalorder %s430_s3, %s613_s4  ;;  %p619_p10 = scmp.lt.s32.totalorder %s613_s4, %s613_s4 }
  0x28   :  { %546 = vset.pattern.permute.xlu1 %v650_v14 }
  0x29   :  { %40 = vperm.xlu1 %546, %v36_v3   ;;  %481 = vmatpush3.bf16.msra.mxu0 %v572_v19  ;;  %p620_p11 = por %p619_p10, %p618_p9 }
  0x2a   :  { %482 = vmatprep.subr.bf16.mxu0 %v573_v20  ;;  %510 = vmatpush3.bf16.msra.mxu1 %v582_v46 }
  0x2b   :  { %511 = vmatprep.subr.bf16.mxu1 %v644_v2  ;;  %p621_p12 = pnand %p620_p11, %p614_p8 }
  0x2d   :  { %483 = vmatpush3.bf16.msra.mxu0 %v574_v21 }
  0x2e   :  { %484 = vmatprep.subr.bf16.mxu0 %v575_v23  ;;  %512 = vmatpush3.bf16.msra.mxu1 %v583_v47 }
  0x2f   :  { %513 = vmatprep.subr.bf16.mxu1 %v644_v2 }
  0x31   :  { %485 = vmatpush3.bf16.msra.mxu0 %v576_v24 }
  0x32   :  { %486 = vmatprep.subr.bf16.mxu0 %v577_v28  ;;  %514 = vmatpush3.bf16.msra.mxu1 %v584_v48 }
  0x33   :  { %515 = vmatprep.subr.bf16.mxu1 %v644_v2 }
  0x35   :  { %487 = vmatpush3.bf16.msra.mxu0 %v578_v29 }
  0x36   :  { %516 = vmatpush3.bf16.msra.mxu1 %v585_v7 }
  0x37   :  { %517 = vmatprep.subr.bf16.mxu1 %v644_v2 }
  0x3a   :  { %518 = vmatpush3.bf16.msra.mxu1 %v586_v8 }
  0x94   :  { %v77_v26 = vpop.permute.xlu1 %76 }
  0x95   :  { %v71_v27 = vpop.permute.xlu0 %70  ;;  %vm78_vm0 = vcmp.eq.s32.totalorder %v77_v26, %v38_v25 }
  0x96   :  { %vm72_vm1 = vcmp.eq.s32.totalorder %v71_v27, %v38_v25  ;;  %v444_v32 = vsel %vm78_vm0, 1.0, %v644_v2 }
  0x97   :  { %v443_v33 = vsel %vm72_vm1, 1.0, %v644_v2 }
  0x99   :  { %v53_v30 = vpop.permute.xlu1 %52 }
  0x9a   :  { %v47_v31 = vpop.permute.xlu0 %46  ;;  %vm54_vm2 = vcmp.eq.s32.totalorder %v53_v30, %v38_v25 }
  0x9b   :  { %vm48_vm3 = vcmp.eq.s32.totalorder %v47_v31, %v38_v25  ;;  %v440_v34 = vsel %vm54_vm2, 1.0, %v644_v2 }
  0x9c   :  { %v439_v35 = vsel %vm48_vm3, 1.0, %v644_v2  ;;  %v552_v37 = vpack.i.bf16 %v440_v34, %v444_v32 }
  0x9d   :  { %v547_v36 = vpack.i.bf16 %v439_v35, %v443_v33 }
  0x9e   :  { %553 = vrot.lane.b32.xlu1 %v552_v37, %s640_s28  ;;  %v83_v39 = vpop.permute.xlu1 %82 }
  0x9f   :  { %548 = vrot.lane.b32.xlu0 %v547_v36, %s651_s9  ;;  %v59_v40 = vpop.permute.xlu0 %58  ;;  %vm84_vm4 = vcmp.eq.s32.totalorder %v83_v39, %v38_v25 }
  0xa0   :  { %vm60_vm5 = vcmp.eq.s32.totalorder %v59_v40, %v38_v25  ;;  %v445_v42 = vsel %vm84_vm4, 1.0, %v644_v2 }
  0xa1   :  { %v441_v43 = vsel %vm60_vm5, 1.0, %v644_v2 }
  0xa2   :  { %v557_v44 = vpack.i.bf16 %v441_v43, %v445_v42 }
  0xa3   :  { %v65_v49 = vpop.permute.xlu1 %64 }
  0xa4   :  { %558 = vrot.lane.b32.xlu0 %v557_v44, %s652_s12  ;;  %vm66_vm7 = vcmp.eq.s32.totalorder %v65_v49, %v38_v25 }
  0xa5   :  { %v442_v56 = vsel %vm66_vm7, 1.0, %v644_v2 }
  0xa8   :  { %v41_v50 = vpop.permute.xlu1 %40 }
  0xa9   :  { %vm42_vm6 = vcmp.eq.s32.totalorder %v41_v50, %v38_v25 }
  0xaa   :  { %v438_v53 = vsel %vm42_vm6, 1.0, %v644_v2 }
 0x110   :  { %v554_v51 = vpop.permute.xlu1 %553 }
 0x111   :  { %v549_v52 = vpop.permute.xlu0 %548  ;;  %v556_v57 = vunpack.i.h.bf16 %v554_v51  ;;  %v555_v58 = vunpack.i.l.bf16 %v554_v51 }
 0x112   :  { %v551_v54 = vunpack.i.h.bf16 %v549_v52  ;;  %v550_v55 = vunpack.i.l.bf16 %v549_v52 }
 0x114   :  { %v112_v59 = vsel %vm111_vm8, %v438_v53, %v551_v54  ;;  %v117_v60 = vsel %vm111_vm8, %v442_v56, %v550_v55 }
 0x115   :  { %v118_v0 = vsel %vm113_vm9, %v117_v60, %v555_v58  ;;  %v114_v1 = vsel %vm113_vm9, %v112_v59, %v556_v57 }
 0x116   :  { %v559_v61 = vpop.permute.xlu0 %558 }
 0x117   :  { %v561_v62 = vunpack.i.h.bf16 %v559_v61  ;;  %v560_v63 = vunpack.i.l.bf16 %v559_v61 }
 0x119   :  { %v119_v3 = vsel %vm115_vm10, %v118_v0, %v560_v63  ;;  %v116_v4 = vsel %vm115_vm10, %v114_v1, %v561_v62 }
 0x11a   :  { %v121_v5 = vpack.c.bf16 %v119_v3, %v119_v3  ;;  %v120_v6 = vpack.c.bf16 %v116_v4, %v116_v4 }
 0x11c   :  { %289 = vmatprep.mubr.bf16.mxu0 %v121_v5 }
 0x11d   :  { %290 = vmatmul.mubr.bf16.vlgmr.msra.gmra.mrb[0].mxu0 %v120_v6 }
 0x1f0   :  { %v488_v9 = vpop.f32.mrb[0].mxu0 }
 0x1f1   :  { %v489_v11 = vpop.f32.mrb[1].mxu0 }
 0x1f2   :  { %v490_v12 = vadd.f32 %v489_v11, %v488_v9  ;;  %v491_v13 = vpop.f32.mrb[2].mxu0 }
 0x1f3   :  { %v492_v14 = vpop.f32.mrb[3].mxu0 }
 0x1f4   :  { %v292_v15 = vadd.f32 %v490_v12, %v446_v10 }
 0x1f6   :  { %v297_v16 = vmax.f32 %v292_v15, 0.0 }
 0x1f8   :  { %v298_v17 = vpack.c.bf16 %v297_v16, %v297_v16 }
 0x1fa   :  { %520 = vmatmul.mubr.bf16.vlgmr.msra.gmra.mrb[0].mxu1 %v298_v17 }
 0x2cd   :  { %v404_v19 = vpop.f32.mrb[0].mxu1 }
 0x2ce   :  { %v405_v2 = vadd.f32 %v463_v18, %v404_v19  ;;  %v521_v20 = vpop.f32.mrb[1].mxu1 }
 0x2cf   :  { %v407_v21 = vpop.f32.mrb[2].mxu1 }
 0x2d0   :  { %v522_v22 = vpop.f32.mrb[3].mxu1  ;;  %v411_v23 = vsel %vm410_vm12, %v405_v2, -inf }
 0x2d1   :  { %412 = vmax.xlane.f32.xlu1 %v411_v23 }
 0x35e   :  { %v413_v24 = vpop.xlane.xlu1 %412 }
 0x35f   :  { %v414_v25 = vsub.f32 %v405_v2, %v413_v24 }
 0x361   :  { %v415_v26 = vmul.f32 1.442695, %v414_v25 }
 0x363   :  { %587 = vpow2.f32 %v415_v26 }
 0x36d   :  { %v588_v27 = vpop.eup %587 }
 0x36e   :  { %v417_v28 = vsel %vm410_vm12, %v588_v27, 0.0 }
 0x36f   :  { %418 = vadd.xlane.f32.xlu0 %v417_v28 }
 0x3fc   :  { %v419_v29 = vpop.xlane.xlu0 %418 }
 0x3fd   :  { %589 = vrcp.f32 %v419_v29 }
 0x407   :  { %v590_v30 = vpop.eup %589 }
 0x408   :  { %v421_v31 = vmul.f32 %v590_v30, %v588_v27 }
 0x40a   :  { %422 = vst.msk [vmem:[#allocation5] sm:$0x3] %vm410_vm12, %v421_v31 }
 0x40b   :  { %624 = shalt.err (!%p621_p12)
}
 0x40c   :  { %s625_s6 = scalar_lea.hbm %s770_s5, 32 }
 0x40d   :  { %p626_p13 = scmp.ne.s32.totalorder %s770_s5, %s625_s6  ;;  %p629_p0 = scmp.lt.u32.totalorder %s625_s6, %s770_s5 }
 0x40f   :  { %p631_p1 = pnand %p629_p0, %p626_p13 }
 0x411   :  { %634 = shalt.err (!%p631_p1)
}
 0x412   :  { %432 = dma.vmem_to_hbm [thread:$0]  %s430_s3, 32, %s770_s5, [#allocation4]  }
 0x413   :  { %637 = dma.done.wait [#allocation4], 32  }
 0x414   :  { %638 = vsyncadd [#allocation4], 4294967264 }
 0x415   :  { %436 = vsyncpa [#allocation3], 1 }
 0x416   :  { %437 = vsyncpa [#allocation4], 1 }

</bundles_post_ra>
